<compile_context>
chip_gen: v5e
topology: v5e:2x2
jax: 0.10.0
libtpu: 0.0.40
codegen_flags: <defaults>
</compile_context>

<pallas_src>
import jax
import jax.numpy as jnp
from jax.experimental import pallas as pl
from jax.experimental.pallas import tpu as pltpu

LANE = 128  # TPU lane width: hidden feature dims (30, 20) are zero-padded to this.


def _round_up(n, m):
    return ((n + m - 1) // m) * m


def mlp_kernel(x_ref, w1_ref, b1_ref, w2_ref, b2_ref, w3_ref, b3_ref, o_ref):
    # One batch tile per grid step; weights/biases are whole and VMEM-resident.
    x = x_ref[...]

    # Layer 1: Linear(num_inputs, 30 -> 128 padded) + ReLU   (MXU, f32 accumulate)
    h1 = jnp.dot(x, w1_ref[...], preferred_element_type=jnp.float32) + b1_ref[...]
    h1 = jnp.maximum(h1, 0.0)

    # Layer 2: Linear(30 -> 128, 20 -> 128 padded) + ReLU
    h2 = jnp.dot(h1, w2_ref[...], preferred_element_type=jnp.float32) + b2_ref[...]
    h2 = jnp.maximum(h2, 0.0)

    # Layer 3: Linear(20 -> 128, num_outputs) -> logits.  Output keeps its true
    # (small) last dim, so only useful lanes are stored back to HBM.
    logits = jnp.dot(h2, w3_ref[...], preferred_element_type=jnp.float32) + b3_ref[...]
    o_ref[...] = logits.astype(o_ref.dtype)


def neural_network_forward(x, padded_params, num_outputs, *, block_batch=2048):
    """x: [B, num_inputs] float32. padded_params: lane-padded transposed weights/biases."""
    w1, b1, w2, b2, w3, b3 = (
        padded_params["w1"], padded_params["b1"], padded_params["w2"],
        padded_params["b2"], padded_params["w3"], padded_params["b3"],
    )
    B, num_inputs = x.shape

    # Batch tile: multiple of 8 sublanes, <= block_batch, and capped so the grid has
    # at least 2 steps when B >= 16 (lets v7x shard the "parallel" axis across both
    # TensorCores).  No padding of x: cdiv grid + Pallas boundary masking handle a
    # ragged last tile (out-of-bounds output rows are never written).
    TB = min(block_batch, max(8, _round_up(pl.cdiv(B, 2), 8)))
    grid = (pl.cdiv(B, TB),)

    # Weights/biases: constant block index -> stay resident in VMEM across grid steps.
    def resident(a):
        return pl.BlockSpec(a.shape, lambda i: (0, 0))

    out = pl.pallas_call(
        mlp_kernel,
        out_shape=jax.ShapeDtypeStruct((B, num_outputs), jnp.float32),
        grid=grid,
        in_specs=[
            pl.BlockSpec((TB, num_inputs), lambda i: (i, 0)),  # batch-tiled activations
            resident(w1), resident(b1),
            resident(w2), resident(b2),
            resident(w3), resident(b3),
        ],
        out_specs=pl.BlockSpec((TB, num_outputs), lambda i: (i, 0)),
        compiler_params=pltpu.CompilerParams(
            dimension_semantics=("parallel",),  # batch tiles are independent
        ),
    )(x, w1, b1, w2, b2, w3, b3)

    return out


def init_params(key, num_inputs, num_outputs):
    """Deterministic init mirroring nn.Linear. Returns (raw, lane-padded) param dicts.

    Raw weights are stored transposed as [in, out]; padded versions zero-pad the
    hidden feature dims up to LANE so intermediate activations are lane-dense.
    Zero-padded rows/cols + zero-padded biases keep padded lanes exactly zero through
    ReLU, so they contribute nothing to subsequent layers.  The final layer keeps its
    true num_outputs width (no padding) so the HBM writeback stays minimal.
    """
    def linear_init(k, fan_in, fan_out):
        kw, kb = jax.random.split(k)
        bound = 1.0 / jnp.sqrt(float(fan_in))
        w = jax.random.uniform(kw, (fan_in, fan_out), jnp.float32, -bound, bound)
        b = jax.random.uniform(kb, (1, fan_out), jnp.float32, -bound, bound)
        return w, b

    k1, k2, k3 = jax.random.split(key, 3)
    w1, b1 = linear_init(k1, num_inputs, 30)
    w2, b2 = linear_init(k2, 30, 20)
    w3, b3 = linear_init(k3, 20, num_outputs)
    raw = {"w1": w1, "b1": b1, "w2": w2, "b2": b2, "w3": w3, "b3": b3}

    def pad2(a, rows, cols):
        return jnp.pad(a, ((0, rows - a.shape[0]), (0, cols - a.shape[1])))

    padded = {
        "w1": pad2(w1, num_inputs, LANE), "b1": pad2(b1, 1, LANE),
        "w2": pad2(w2, LANE, LANE),       "b2": pad2(b2, 1, LANE),
        "w3": pad2(w3, LANE, num_outputs), "b3": b3,
    }
    return raw, padded


def reference_forward(x, p):
    h1 = jnp.maximum(x @ p["w1"] + p["b1"], 0.0)
    h2 = jnp.maximum(h1 @ p["w2"] + p["b2"], 0.0)
    return h2 @ p["w3"] + p["b3"]


if __name__ == "__main__":
    key = jax.random.PRNGKey(0)
    k_x, k_p = jax.random.split(key)

    batch = 8
    num_inputs = 32
    num_outputs = 4

    x = jax.random.normal(k_x, (batch, num_inputs), jnp.float32)
    raw_params, padded_params = init_params(k_p, num_inputs, num_outputs)

    out = neural_network_forward(x, padded_params, num_outputs)
    out = jax.block_until_ready(out)

    ref = reference_forward(x, raw_params)
    assert out.shape == (batch, num_outputs)
    assert jnp.allclose(out, ref, atol=1e-5, rtol=1e-5)

    # NOTE: at batch ~8 the whole MLP is launch-overhead-bound; the Pallas path pays
    # off at large batch (grid >= 2) or when fused into surrounding kernels.
    print("KERNEL_OK")
</pallas_src>

<mosaic_0001>
module attributes {stable_mosaic.version = 11 : i64} {
  func.func @mlp_kernel(%arg0: i32, %arg1: memref<8x32xf32, #tpu.memory_space<vmem>>, %arg2: memref<32x128xf32, #tpu.memory_space<vmem>>, %arg3: memref<1x128xf32, #tpu.memory_space<vmem>>, %arg4: memref<128x128xf32, #tpu.memory_space<vmem>>, %arg5: memref<1x128xf32, #tpu.memory_space<vmem>>, %arg6: memref<128x4xf32, #tpu.memory_space<vmem>>, %arg7: memref<1x4xf32, #tpu.memory_space<vmem>>, %arg8: memref<8x4xf32, #tpu.memory_space<vmem>>) attributes {dimension_semantics = [#tpu.dimension_semantics<parallel>], iteration_bounds = array<i64: 1>, scalar_prefetch = 0 : i64, scratch_operands = 0 : i64, tpu.core_type = #tpu.core_type<tc>, window_params = [{transform_indices = @transform_0, window_bounds = array<i64: 8, 32>}, {pipeline_mode = #tpu.pipeline_mode<synchronous>, transform_indices = @transform_1, window_bounds = array<i64: 32, 128>}, {pipeline_mode = #tpu.pipeline_mode<synchronous>, transform_indices = @transform_2, window_bounds = array<i64: 1, 128>}, {pipeline_mode = #tpu.pipeline_mode<synchronous>, transform_indices = @transform_3, window_bounds = array<i64: 128, 128>}, {pipeline_mode = #tpu.pipeline_mode<synchronous>, transform_indices = @transform_4, window_bounds = array<i64: 1, 128>}, {pipeline_mode = #tpu.pipeline_mode<synchronous>, transform_indices = @transform_5, window_bounds = array<i64: 128, 4>}, {pipeline_mode = #tpu.pipeline_mode<synchronous>, transform_indices = @transform_6, window_bounds = array<i64: 1, 4>}, {transform_indices = @transform_7, window_bounds = array<i64: 8, 4>}]} {
    %c0 = arith.constant 0 : index
    %c0_0 = arith.constant 0 : index
    %0 = vector.load %arg1[%c0, %c0_0] : memref<8x32xf32, #tpu.memory_space<vmem>>, vector<8x32xf32>
    %c0_1 = arith.constant 0 : index
    %c0_2 = arith.constant 0 : index
    %1 = vector.load %arg2[%c0_1, %c0_2] : memref<32x128xf32, #tpu.memory_space<vmem>>, vector<32x128xf32>
    %cst = arith.constant dense<0.000000e+00> : vector<8x128xf32>
    %2 = tpu.matmul %0, %1, %cst {dimension_numbers = #tpu.dot_dimension_numbers<[1], [0], [0], [1], [0, 0, 1, 1], [], []>} : vector<8x32xf32>, vector<32x128xf32>, vector<8x128xf32> -> vector<8x128xf32>
    %c0_3 = arith.constant 0 : index
    %c0_4 = arith.constant 0 : index
    %3 = vector.load %arg3[%c0_3, %c0_4] : memref<1x128xf32, #tpu.memory_space<vmem>>, vector<1x128xf32>
    %4 = vector.broadcast %3 : vector<1x128xf32> to vector<8x128xf32>
    %5 = arith.addf %2, %4 : vector<8x128xf32>
    %cst_5 = arith.constant 0.000000e+00 : f32
    %6 = vector.broadcast %cst_5 : f32 to vector<8x128xf32>
    %7 = arith.maximumf %5, %6 : vector<8x128xf32>
    %c0_6 = arith.constant 0 : index
    %c0_7 = arith.constant 0 : index
    %8 = vector.load %arg4[%c0_6, %c0_7] : memref<128x128xf32, #tpu.memory_space<vmem>>, vector<128x128xf32>
    %cst_8 = arith.constant dense<0.000000e+00> : vector<8x128xf32>
    %9 = tpu.matmul %7, %8, %cst_8 {dimension_numbers = #tpu.dot_dimension_numbers<[1], [0], [0], [1], [0, 0, 1, 1], [], []>} : vector<8x128xf32>, vector<128x128xf32>, vector<8x128xf32> -> vector<8x128xf32>
    %c0_9 = arith.constant 0 : index
    %c0_10 = arith.constant 0 : index
    %10 = vector.load %arg5[%c0_9, %c0_10] : memref<1x128xf32, #tpu.memory_space<vmem>>, vector<1x128xf32>
    %11 = vector.broadcast %10 : vector<1x128xf32> to vector<8x128xf32>
    %12 = arith.addf %9, %11 : vector<8x128xf32>
    %cst_11 = arith.constant 0.000000e+00 : f32
    %13 = vector.broadcast %cst_11 : f32 to vector<8x128xf32>
    %14 = arith.maximumf %12, %13 : vector<8x128xf32>
    %c0_12 = arith.constant 0 : index
    %c0_13 = arith.constant 0 : index
    %15 = vector.load %arg6[%c0_12, %c0_13] : memref<128x4xf32, #tpu.memory_space<vmem>>, vector<128x4xf32>
    %cst_14 = arith.constant dense<0.000000e+00> : vector<8x4xf32>
    %16 = tpu.matmul %14, %15, %cst_14 {dimension_numbers = #tpu.dot_dimension_numbers<[1], [0], [0], [1], [0, 0, 1, 1], [], []>} : vector<8x128xf32>, vector<128x4xf32>, vector<8x4xf32> -> vector<8x4xf32>
    %c0_15 = arith.constant 0 : index
    %c0_16 = arith.constant 0 : index
    %17 = vector.load %arg7[%c0_15, %c0_16] : memref<1x4xf32, #tpu.memory_space<vmem>>, vector<1x4xf32>
    %18 = vector.broadcast %17 : vector<1x4xf32> to vector<8x4xf32>
    %19 = arith.addf %16, %18 : vector<8x4xf32>
    %c0_17 = arith.constant 0 : index
    %c0_18 = arith.constant 0 : index
    %20 = vector.load %arg8[%c0_17, %c0_18] : memref<8x4xf32, #tpu.memory_space<vmem>>, vector<8x4xf32>
    tpu.vector_store %arg8[%c0_17, %c0_18], %19 {strides = array<i32>} : memref<8x4xf32, #tpu.memory_space<vmem>>, vector<8x4xf32>,
    return
  }
  func.func @transform_0(%arg0: i32) -> (i32, i32) {
    %c0_i32 = arith.constant 0 : i32
    %c0_i32_0 = arith.constant 0 : i32
    return %arg0, %c0_i32 : i32, i32
  }
  func.func @transform_1(%arg0: i32) -> (i32, i32) {
    %c0_i32 = arith.constant 0 : i32
    %c0_i32_0 = arith.constant 0 : i32
    %c0_i32_1 = arith.constant 0 : i32
    return %c0_i32, %c0_i32_0 : i32, i32
  }
  func.func @transform_2(%arg0: i32) -> (i32, i32) {
    %c0_i32 = arith.constant 0 : i32
    %c0_i32_0 = arith.constant 0 : i32
    %c0_i32_1 = arith.constant 0 : i32
    return %c0_i32, %c0_i32_0 : i32, i32
  }
  func.func @transform_3(%arg0: i32) -> (i32, i32) {
    %c0_i32 = arith.constant 0 : i32
    %c0_i32_0 = arith.constant 0 : i32
    %c0_i32_1 = arith.constant 0 : i32
    return %c0_i32, %c0_i32_0 : i32, i32
  }
  func.func @transform_4(%arg0: i32) -> (i32, i32) {
    %c0_i32 = arith.constant 0 : i32
    %c0_i32_0 = arith.constant 0 : i32
    %c0_i32_1 = arith.constant 0 : i32
    return %c0_i32, %c0_i32_0 : i32, i32
  }
  func.func @transform_5(%arg0: i32) -> (i32, i32) {
    %c0_i32 = arith.constant 0 : i32
    %c0_i32_0 = arith.constant 0 : i32
    %c0_i32_1 = arith.constant 0 : i32
    return %c0_i32, %c0_i32_0 : i32, i32
  }
  func.func @transform_6(%arg0: i32) -> (i32, i32) {
    %c0_i32 = arith.constant 0 : i32
    %c0_i32_0 = arith.constant 0 : i32
    %c0_i32_1 = arith.constant 0 : i32
    return %c0_i32, %c0_i32_0 : i32, i32
  }
  func.func @transform_7(%arg0: i32) -> (i32, i32) {
    %c0_i32 = arith.constant 0 : i32
    %c0_i32_0 = arith.constant 0 : i32
    return %arg0, %c0_i32 : i32, i32
  }
}

</mosaic_0001>

<bundles_post_ra>
// kernel: tpu_custom_call.1
= control target key start
LH: loop header
LB: loop body
LE: loop exit
PB: predicated region body
PF: predicated region fallthrough
CT: control target
= control target key end

     0   :  { %12 = vsyncpa [#allocation3], 0  ;;  %s397_s0 = inlined_call_operand.hbm [shape: f32[8,32], index: 0, kind: input, shape index: {}]   ;;  %s398_s1 = inlined_call_operand.hbm [shape: f32[32,128], index: 1, kind: input, shape index: {}]   ;;  %s399_s2 = inlined_call_operand.vmem [shape: f32[1,128], index: 2, kind: input, shape index: {}]   ;;  %s400_s3 = inlined_call_operand.vmem [shape: f32[128,128], index: 3, kind: input, shape index: {}]   ;;  %s401_s4 = inlined_call_operand.vmem [shape: f32[1,128], index: 4, kind: input, shape index: {}]   ;;  %s402_s5 = inlined_call_operand.vmem [shape: f32[128,4], index: 5, kind: input, shape index: {}]   ;;  %s403_s6 = inlined_call_operand.vmem [shape: f32[1,4], index: 6, kind: input, shape index: {}]   ;;  %s404_s7 = inlined_call_operand.vmem [shape: f32[8,4], index: 7, kind: output, shape index: {}]  }
   0x1   :  { %s19_s26 = sshll.u32 %s397_s0, 4  ;;  %s20_s26 = int_to_ptr.hbm [resolvable:$true] %s19_s26 }
   0x2   :  { %13 = vsyncpa [#allocation5], 0  ;;  %s239_s27 = smov [#allocation2]   ;;  %s29_s8 = sshll.u32 %s398_s1, 4  ;;  %s30_s8 = int_to_ptr.hbm [resolvable:$true] %s29_s8 }
   0x3   :  { %s21_s28 = sshll.u32 %s239_s27, 4  ;;  %s240_s9 = smov [#allocation4]   ;;  %s22_s28 = int_to_ptr.vmem [resolvable:$true] %s21_s28 }
   0x4   :  { %24 = dma.hbm_to_vmem [thread:$0]  %s20_s26, 128, %s22_s28, [#allocation3]  }
   0x5   :  { %s31_s10 = sshll.u32 %s240_s9, 4  ;;  %s241_s11 = smov 128   ;;  %s32_s10 = int_to_ptr.vmem [resolvable:$true] %s31_s10 }
   0x6   :  { %s242_s12 = smov 8  }
   0x7   :  { %37 = dma.hbm_to_vmem [thread:$0]  %s30_s8, 512, %s32_s10, [#allocation5], %s241_s11, %s241_s11, %s242_s12  }
   0x8   :  { %235 = dma.done.wait [#allocation3], 128  }
   0x9   :  { %236 = vsyncadd [#allocation3], 4294967168 }
   0xa   :  { %237 = dma.done.wait [#allocation5], 512  }
   0xb   :  { %238 = vsyncadd [#allocation5], 4294966784  ;;  %v60_v0 = vld [vmem:[#allocation4 + $0x18] sm:$0xff]  ;;  %v59_v1 = vld [vmem:[#allocation4 + $0x10] sm:$0xff]  ;;  %vm65_vm0 = vcmask 261120   ;;  %vm171_vm1 = vcmask 31744  }
   0xc   :  { %81 = vmatpush.msra.mxu0 %v60_v0  ;;  %v105_v2 = vld [vmem:[%s400_s3 + $0x78] sm:$0xff]  ;;  %v58_v3 = vld [vmem:[#allocation4 + $0x8] sm:$0xff]  ;;  %v103_v5 = vld [vmem:[%s400_s3 + $0x68] sm:$0xff] }
   0xd   :  { %110 = vmatpush.msra.mxu1 %v105_v2  ;;  %v104_v4 = vld [vmem:[%s400_s3 + $0x70] sm:$0xff]  ;;  %v57_v6 = vld [vmem:[#allocation4] sm:$0xff]  ;;  %v56_v7 = vld [vmem:[#allocation2] sm:$0xff] }
   0xe   :  { %82 = vmatpush.msra.mxu0 %v59_v1  ;;  %v102_v8 = vld [vmem:[%s400_s3 + $0x60] sm:$0xff]  ;;  %v101_v9 = vld [vmem:[%s400_s3 + $0x58] sm:$0xff]  ;;  %v100_v10 = vld [vmem:[%s400_s3 + $0x50] sm:$0xff] }
   0xf   :  { %111 = vmatpush.msra.mxu1 %v104_v4  ;;  %v99_v11 = vld [vmem:[%s400_s3 + $0x48] sm:$0xff]  ;;  %v98_v12 = vld [vmem:[%s400_s3 + $0x40] sm:$0xff]  ;;  %v97_v13 = vld [vmem:[%s400_s3 + $0x38] sm:$0xff] }
  0x10   :  { %83 = vmatpush.msra.mxu0 %v58_v3  ;;  %v96_v14 = vld [vmem:[%s400_s3 + $0x30] sm:$0xff]  ;;  %v95_v15 = vld [vmem:[%s400_s3 + $0x28] sm:$0xff]  ;;  %v94_v16 = vld [vmem:[%s400_s3 + $0x20] sm:$0xff] }
  0x11   :  { %112 = vmatpush.msra.mxu1 %v103_v5  ;;  %v93_v17 = vld [vmem:[%s400_s3 + $0x18] sm:$0xff]  ;;  %v92_v18 = vld [vmem:[%s400_s3 + $0x10] sm:$0xff]  ;;  %v91_v19 = vld [vmem:[%s400_s3 + $0x8] sm:$0xff] }
  0x12   :  { %84 = vmatpush.msra.mxu0 %v57_v6  ;;  %v90_v20 = vld [vmem:[%s400_s3] sm:$0xff]  ;;  %v146_v21 = vld [vmem:[%s402_s5 + $0x78] sm:$0xff]  ;;  %v145_v22 = vld [vmem:[%s402_s5 + $0x70] sm:$0xff] }
  0x13   :  { %179 = vmatmul.msk.f32.vlgmr.msra.gmra.mxu0 %vm65_vm0, %v56_v7  ;;  %113 = vmatpush.msra.mxu1 %v102_v8  ;;  %v144_v23 = vld [vmem:[%s402_s5 + $0x68] sm:$0xff]  ;;  %v143_v24 = vld [vmem:[%s402_s5 + $0x60] sm:$0xff]  ;;  %v142_v25 = vld [vmem:[%s402_s5 + $0x58] sm:$0xff] }
  0x14   :  { %151 = vmatpush.msra.mxu2 %v146_v21  ;;  %v141_v26 = vld [vmem:[%s402_s5 + $0x50] sm:$0xff]  ;;  %v140_v27 = vld [vmem:[%s402_s5 + $0x48] sm:$0xff]  ;;  %v139_v28 = vld [vmem:[%s402_s5 + $0x40] sm:$0xff] }
  0x15   :  { %114 = vmatpush.msra.mxu1 %v101_v9  ;;  %v138_v29 = vld [vmem:[%s402_s5 + $0x38] sm:$0xff]  ;;  %v137_v30 = vld [vmem:[%s402_s5 + $0x30] sm:$0xff]  ;;  %v136_v31 = vld [vmem:[%s402_s5 + $0x28] sm:$0xff] }
  0x16   :  { %152 = vmatpush.msra.mxu2 %v145_v22  ;;  %v135_v32 = vld [vmem:[%s402_s5 + $0x20] sm:$0xff]  ;;  %v134_v33 = vld [vmem:[%s402_s5 + $0x18] sm:$0xff]  ;;  %v133_v38 = vld [vmem:[%s402_s5 + $0x10] sm:$0xff] }
  0x17   :  { %115 = vmatpush.msra.mxu1 %v100_v10  ;;  %v184_v34 = vld [vmem:[%s399_s2] ss:$0 sm:$0xff]  ;;  %v132_v39 = vld [vmem:[%s402_s5 + $0x8] sm:$0xff] }
  0x18   :  { %153 = vmatpush.msra.mxu2 %v144_v23  ;;  %v131_v40 = vld [vmem:[%s402_s5] sm:$0xff] }
  0x19   :  { %116 = vmatpush.msra.mxu1 %v99_v11  ;;  %v185_v41 = vld [vmem:[%s401_s4] ss:$0 sm:$0xff] }
  0x1a   :  { %154 = vmatpush.msra.mxu2 %v143_v24  ;;  %v186_v45 = vld [vmem:[%s403_s6] ss:$0 sm:$0xff] }
  0x1b   :  { %117 = vmatpush.msra.mxu1 %v98_v12 }
  0x1c   :  { %155 = vmatpush.msra.mxu2 %v142_v25 }
  0x1d   :  { %118 = vmatpush.msra.mxu1 %v97_v13 }
  0x1e   :  { %156 = vmatpush.msra.mxu2 %v141_v26 }
  0x1f   :  { %119 = vmatpush.msra.mxu1 %v96_v14 }
  0x20   :  { %157 = vmatpush.msra.mxu2 %v140_v27 }
  0x21   :  { %120 = vmatpush.msra.mxu1 %v95_v15 }
  0x22   :  { %158 = vmatpush.msra.mxu2 %v139_v28 }
  0x23   :  { %121 = vmatpush.msra.mxu1 %v94_v16 }
  0x24   :  { %159 = vmatpush.msra.mxu2 %v138_v29 }
  0x25   :  { %122 = vmatpush.msra.mxu1 %v93_v17 }
  0x26   :  { %160 = vmatpush.msra.mxu2 %v137_v30 }
  0x27   :  { %123 = vmatpush.msra.mxu1 %v92_v18 }
  0x28   :  { %161 = vmatpush.msra.mxu2 %v136_v31 }
  0x29   :  { %124 = vmatpush.msra.mxu1 %v91_v19 }
  0x2a   :  { %162 = vmatpush.msra.mxu2 %v135_v32 }
  0x2b   :  { %125 = vmatpush.msra.mxu1 %v90_v20 }
  0x2c   :  { %163 = vmatpush.msra.mxu2 %v134_v33 }
  0x2e   :  { %164 = vmatpush.msra.mxu2 %v133_v38 }
  0x30   :  { %165 = vmatpush.msra.mxu2 %v132_v39 }
  0x32   :  { %166 = vmatpush.msra.mxu2 %v131_v40 }
  0x90   :  { %v86_v35 = vpop.f32.mrf.mxu0 }
  0x91   :  { %v87_v36 = vadd.f32 %v184_v34, %v86_v35 }
  0x93   :  { %v89_v37 = vmax.f32 %v87_v36, 0.0 }
  0x95   :  { %126 = vmatmul.f32.vlgmr.msra.gmra.mxu1 %v89_v37 }
 0x112   :  { %v127_v42 = vpop.f32.mrf.mxu1 }
 0x113   :  { %v128_v43 = vadd.f32 %v185_v41, %v127_v42 }
 0x115   :  { %v130_v44 = vmax.f32 %v128_v43, 0.0 }
 0x117   :  { %167 = vmatmul.f32.vlgmr.msra.gmra.mxu2 %v130_v44 }
 0x19a   :  { %v168_v46 = vpop.f32.mrf.mxu2 }
 0x19b   :  { %v169_v47 = vadd.f32 %v186_v45, %v168_v46 }
 0x19d   :  { %172 = vst.msk [vmem:[%s404_s7] sm:$0xff] %vm171_vm1, %v169_v47 }
 0x19e   :  { %177 = vsyncpa [#allocation3], 1 }
 0x19f   :  { %178 = vsyncpa [#allocation5], 1 }

</bundles_post_ra>
